<compile_context>
chip_gen: v7x
topology: tpu7x:2x2x1
jax: 0.10.0
libtpu: 0.0.40
codegen_flags: <defaults>
</compile_context>

<pallas_src>
import functools

import numpy as np
import jax
import jax.numpy as jnp
from jax.experimental import pallas as pl
from jax.experimental.pallas import tpu as pltpu

HOP_LENGTH = 128                 # hop; one frame = 2 consecutive hop blocks
N_FFT = 256
SAMPLE_RATE = 16000
N_FREQ = N_FFT // 2 + 1          # 129 rfft bins
F_PAD = 256                      # rfft bins padded to a lane multiple of 128
EPS = 1e-7                       # matches np.log(abs(spec) + 1e-7)
DEFAULT_FRAME_TILE = 512         # frames per grid step (multiple of 8)


def _round_up(x, m):
    return ((x + m - 1) // m) * m


def _a_weighting(freqs, min_db=-80.0):
    """librosa.A_weighting, verbatim formula (dB)."""
    f_sq = np.asarray(freqs, dtype=np.float64) ** 2
    const = np.array([12194.217, 20.598997, 107.65265, 737.86223]) ** 2.0
    with np.errstate(divide="ignore"):
        weights = 2.0 + 20.0 * (
            np.log10(const[0])
            + 2.0 * np.log10(f_sq)
            - np.log10(f_sq + const[0])
            - np.log10(f_sq + const[1])
            - 0.5 * np.log10(f_sq + const[2])
            - 0.5 * np.log10(f_sq + const[3])
        )
    return np.maximum(min_db, weights)


def _build_dft_weight():
    """Merged, Hann-windowed real-DFT weight of shape (N_FFT, 2*F_PAD).

    columns [0, N_FREQ)            : real part  ( window * cos )
    columns [F_PAD, F_PAD+N_FREQ)  : imag part  ( window * -sin )
    all remaining columns are exactly zero (padded bins -> power contribution is 0).
    Row n is the n-th sample of the frame, so rows [0,128) multiply hop block t and
    rows [128,256) multiply hop block t+1.
    """
    n = np.arange(N_FFT, dtype=np.float64)
    window = 0.5 - 0.5 * np.cos(2.0 * np.pi * n / N_FFT)      # periodic Hann (fftbins)
    k = np.arange(N_FREQ, dtype=np.float64)
    ang = 2.0 * np.pi * np.outer(n, k) / N_FFT                # (N_FFT, N_FREQ)
    w = np.zeros((N_FFT, 2 * F_PAD), np.float64)
    w[:, :N_FREQ] = window[:, None] * np.cos(ang)
    w[:, F_PAD:F_PAD + N_FREQ] = -window[:, None] * np.sin(ang)
    return jnp.asarray(w, jnp.float32)


def _fold_constants():
    """Compile-time scale/bias folding the A-weighting and the padded-bin correction.

    mean_k(log|S_k| + aw_k)
        = (0.5/N_FREQ) * sum_{c=0..F_PAD-1} log(re_c^2 + im_c^2 + EPS^2)
          - (F_PAD - N_FREQ) * log(EPS) / N_FREQ + mean(aw)
    because the (F_PAD - N_FREQ)=127 zero-padded columns contribute exactly log(EPS)
    each, and sqrt+log is fused into 0.5*log(.^2 + EPS^2).
    """
    freqs = np.fft.rfftfreq(N_FFT, d=1.0 / SAMPLE_RATE)       # == librosa.fft_frequencies
    aw = _a_weighting(freqs)
    scale = 0.5 / N_FREQ
    bias = float(aw.mean() - (F_PAD - N_FREQ) * np.log(EPS) / N_FREQ)
    return scale, bias


def _loudness_kernel(tiles_ref, w_ref, out_ref, *, frame_tile, scale, bias):
    # tiles_ref : (frame_tile + 8, HOP)   hop blocks for this (batch, frame-tile)
    # w_ref     : (N_FFT, 2*F_PAD)        merged cos|sin windowed DFT weights
    # out_ref   : (frame_tile,)           lane-dense loudness row
    hop_blocks = tiles_ref[...]                               # (TT+8, 128)
    w = w_ref[...]                                            # (256, 512)

    lo = hop_blocks[:frame_tile, :]                           # samples   0..127 of frame t
    hi = hop_blocks[1:frame_tile + 1, :]                      # samples 128..255 of frame t

    # Split windowed real-DFT: frames are never materialized.
    acc = jnp.dot(lo, w[:HOP_LENGTH, :], preferred_element_type=jnp.float32)
    acc = acc + jnp.dot(hi, w[HOP_LENGTH:, :], preferred_element_type=jnp.float32)

    re = acc[:, :F_PAD]                                       # aligned 128-lane slices
    im = acc[:, F_PAD:]
    power = re * re + im * im                                 # padded bins are exactly 0

    # 0.5*log(p + EPS^2) fuses sqrt+log; A-weighting and the 127 padded-bin terms are
    # folded into the compile-time (scale, bias) pair.
    loud = jnp.sum(jnp.log(power + EPS * EPS), axis=-1) * scale + bias   # (TT,)
    out_ref[...] = loud


def loudness_encoder(x, frame_tile=DEFAULT_FRAME_TILE):
    """JAX/Pallas equivalent of LoudnessEncoder.forward -> (B, T, 1) float32."""
    x = jnp.asarray(x, jnp.float32)
    if x.ndim == 2:
        x = x[:, None, :]
    xm = jnp.mean(x, axis=1)                                  # channel mean (glue)
    B, L = xm.shape

    T = 1 + L // HOP_LENGTH                                   # librosa center=True frames
    frame_tile = max(8, _round_up(frame_tile, 8))
    TT = min(frame_tile, _round_up(T, 8))                     # frames per grid step
    nT = pl.cdiv(T, TT)
    Tp = nT * TT

    # center=True STFT padding (librosa<0.10 default pad_mode='reflect'), then zero-pad
    # the tail so the gather-free hop-block packing below works for any L / tiling.
    pad = N_FFT // 2
    padded = jnp.pad(xm, ((0, 0), (pad, pad)), mode="reflect")
    total = (Tp + TT) * HOP_LENGTH
    padded = jnp.pad(padded, ((0, 0), (0, total - (L + 2 * pad))))
    blocks = padded.reshape(B, Tp + TT, HOP_LENGTH)           # non-overlapping hop blocks

    # Per-tile slabs of TT+8 hop blocks (only TT+1 are used; +8 keeps the sublane dim a
    # multiple of 8).  Only slices/reshapes/concat — no 2x overlapped-frame gather.
    head = blocks[:, :Tp].reshape(B, nT, TT, HOP_LENGTH)
    tail = blocks[:, TT:TT + Tp].reshape(B, nT, TT, HOP_LENGTH)[:, :, :8]
    tiles = jnp.concatenate([head, tail], axis=2)             # (B, nT, TT+8, HOP)

    w = _build_dft_weight()                                   # (256, 512) f32, ~512 KiB
    scale, bias = _fold_constants()
    kernel = functools.partial(_loudness_kernel, frame_tile=TT, scale=scale, bias=bias)

    out = pl.pallas_call(
        kernel,
        out_shape=jax.ShapeDtypeStruct((B, nT, TT), jnp.float32),
        grid=(B, nT),
        in_specs=[
            # one (TT+8, HOP) slab of hop blocks per (batch, tile) step
            pl.BlockSpec((None, None, TT + 8, HOP_LENGTH), lambda b, j: (b, j, 0, 0)),
            # constant merged DFT weight: block index never changes -> no re-DMA.
            pl.BlockSpec((N_FFT, 2 * F_PAD), lambda b, j: (0, 0)),
        ],
        # lane-dense (TT,) output row per step
        out_specs=pl.BlockSpec((None, None, TT), lambda b, j: (b, j, 0)),
        compiler_params=pltpu.CompilerParams(
            dimension_semantics=("parallel", "parallel")),
    )(tiles, w)

    loud = out.reshape(B, Tp)[:, :T]                          # drop padded frames
    return loud[..., None]                                    # (B, T, 1)


def loudness_reference(x_np):
    """Pure numpy reference mirroring the librosa-based PyTorch forward."""
    x = np.asarray(x_np, np.float64)
    if x.ndim == 2:
        x = x[:, None, :]
    xm = x.mean(axis=1)
    pad = N_FFT // 2
    padded = np.pad(xm, ((0, 0), (pad, pad)), mode="reflect")
    T = 1 + xm.shape[1] // HOP_LENGTH
    n = np.arange(N_FFT)
    window = 0.5 - 0.5 * np.cos(2.0 * np.pi * n / N_FFT)
    idx = np.arange(T)[:, None] * HOP_LENGTH + n[None, :]
    frames = padded[:, idx] * window                          # (B, T, N_FFT)
    spec = np.abs(np.fft.rfft(frames, n=N_FFT, axis=-1))      # (B, T, N_FREQ)
    spec = np.log(spec + EPS)
    aw = _a_weighting(np.fft.rfftfreq(N_FFT, 1.0 / SAMPLE_RATE))
    spec = spec + aw[None, None, :]
    return spec.mean(axis=-1)[..., None].astype(np.float32)   # (B, T, 1)


if __name__ == "__main__":
    key = jax.random.PRNGKey(0)

    # Case 1: batch=2, channels=2, signal_len=512
    B, C, L = 2, 2, 512
    x = jax.random.normal(key, (B, C, L), dtype=jnp.float32)
    out = jax.block_until_ready(loudness_encoder(x))
    T = 1 + L // HOP_LENGTH
    assert out.shape == (B, T, 1) and out.dtype == jnp.float32
    ref = loudness_reference(np.asarray(x))
    if not np.allclose(np.asarray(out), ref, atol=5e-2, rtol=5e-3):
        raise AssertionError("Pallas loudness does not match reference (case 1)")

    # Case 2: different batch/channels/length (T not a multiple of 8 -> padded frames path)
    B2, C2, L2 = 1, 3, 2048
    x2 = jax.random.normal(jax.random.PRNGKey(1), (B2, C2, L2), dtype=jnp.float32)
    out2 = jax.block_until_ready(loudness_encoder(x2))
    T2 = 1 + L2 // HOP_LENGTH
    assert out2.shape == (B2, T2, 1) and out2.dtype == jnp.float32
    ref2 = loudness_reference(np.asarray(x2))
    if not np.allclose(np.asarray(out2), ref2, atol=5e-2, rtol=5e-3):
        raise AssertionError("Pallas loudness does not match reference (case 2)")

    print("KERNEL_OK")
</pallas_src>

<mosaic_0001>
module attributes {stable_mosaic.version = 11 : i64} {
  func.func @_loudness_kernel(%arg0: i32, %arg1: i32, %arg2: memref<1x1x16x128xf32, #tpu.memory_space<vmem>>, %arg3: memref<256x512xf32, #tpu.memory_space<vmem>>, %arg4: memref<1x1x8xf32, #tpu.memory_space<vmem>>) attributes {dimension_semantics = [#tpu.dimension_semantics<parallel>, #tpu.dimension_semantics<parallel>], iteration_bounds = array<i64: 2, 1>, scalar_prefetch = 0 : i64, scratch_operands = 0 : i64, tpu.core_type = #tpu.core_type<tc>, window_params = [{transform_indices = @transform_0, window_bounds = array<i64: 1, 1, 16, 128>}, {pipeline_mode = #tpu.pipeline_mode<synchronous>, transform_indices = @transform_1, window_bounds = array<i64: 256, 512>}, {transform_indices = @transform_2, window_bounds = array<i64: 1, 1, 8>}]} {
    %c0 = arith.constant 0 : index
    %c0_0 = arith.constant 0 : index
    %c0_1 = arith.constant 0 : index
    %c0_2 = arith.constant 0 : index
    %0 = vector.load %arg2[%c0, %c0_0, %c0_1, %c0_2] : memref<1x1x16x128xf32, #tpu.memory_space<vmem>>, vector<1x1x16x128xf32>
    %1 = vector.shape_cast %0 : vector<1x1x16x128xf32> to vector<16x128xf32>
    %c0_3 = arith.constant 0 : index
    %c0_4 = arith.constant 0 : index
    %2 = vector.load %arg3[%c0_3, %c0_4] : memref<256x512xf32, #tpu.memory_space<vmem>>, vector<256x512xf32>
    %3 = vector.extract_strided_slice %1 {offsets = [0, 0], sizes = [8, 128], strides = [1, 1]} : vector<16x128xf32> to vector<8x128xf32>
    %4 = vector.extract_strided_slice %1 {offsets = [1, 0], sizes = [8, 128], strides = [1, 1]} : vector<16x128xf32> to vector<8x128xf32>
    %5 = vector.extract_strided_slice %2 {offsets = [0, 0], sizes = [128, 512], strides = [1, 1]} : vector<256x512xf32> to vector<128x512xf32>
    %cst = arith.constant dense<0.000000e+00> : vector<8x512xf32>
    %6 = tpu.matmul %3, %5, %cst {dimension_numbers = #tpu.dot_dimension_numbers<[1], [0], [0], [1], [0, 0, 1, 1], [], []>} : vector<8x128xf32>, vector<128x512xf32>, vector<8x512xf32> -> vector<8x512xf32>
    %7 = vector.extract_strided_slice %2 {offsets = [128, 0], sizes = [128, 512], strides = [1, 1]} : vector<256x512xf32> to vector<128x512xf32>
    %cst_5 = arith.constant dense<0.000000e+00> : vector<8x512xf32>
    %8 = tpu.matmul %4, %7, %cst_5 {dimension_numbers = #tpu.dot_dimension_numbers<[1], [0], [0], [1], [0, 0, 1, 1], [], []>} : vector<8x128xf32>, vector<128x512xf32>, vector<8x512xf32> -> vector<8x512xf32>
    %9 = arith.addf %6, %8 : vector<8x512xf32>
    %10 = vector.extract_strided_slice %9 {offsets = [0, 0], sizes = [8, 256], strides = [1, 1]} : vector<8x512xf32> to vector<8x256xf32>
    %11 = vector.extract_strided_slice %9 {offsets = [0, 256], sizes = [8, 256], strides = [1, 1]} : vector<8x512xf32> to vector<8x256xf32>
    %12 = arith.mulf %10, %10 : vector<8x256xf32>
    %13 = arith.mulf %11, %11 : vector<8x256xf32>
    %14 = arith.addf %12, %13 : vector<8x256xf32>
    %cst_6 = arith.constant 9.99999982E-15 : f32
    %15 = vector.broadcast %cst_6 : f32 to vector<8x256xf32>
    %16 = arith.addf %14, %15 : vector<8x256xf32>
    %17 = math.log %16 : vector<8x256xf32>
    %cst_7 = arith.constant dense<0.000000e+00> : vector<8xf32>
    %18 = vector.multi_reduction <add>, %17, %cst_7 [1] : vector<8x256xf32> to vector<8xf32>
    %cst_8 = arith.constant 0.00387596898 : f32
    %19 = vector.broadcast %cst_8 : f32 to vector<8xf32>
    %20 = arith.mulf %18, %19 : vector<8xf32>
    %cst_9 = arith.constant 14.9373693 : f32
    %21 = vector.broadcast %cst_9 : f32 to vector<8xf32>
    %22 = arith.addf %20, %21 : vector<8xf32>
    %c0_10 = arith.constant 0 : index
    %c0_11 = arith.constant 0 : index
    %c0_12 = arith.constant 0 : index
    %23 = vector.load %arg4[%c0_10, %c0_11, %c0_12] : memref<1x1x8xf32, #tpu.memory_space<vmem>>, vector<1x1x8xf32>
    %24 = vector.shape_cast %23 : vector<1x1x8xf32> to vector<8xf32>
    %25 = vector.shape_cast %22 : vector<8xf32> to vector<1x1x8xf32>
    tpu.vector_store %arg4[%c0_10, %c0_11, %c0_12], %25 {strides = array<i32>} : memref<1x1x8xf32, #tpu.memory_space<vmem>>, vector<1x1x8xf32>,
    return
  }
  func.func @transform_0(%arg0: i32, %arg1: i32) -> (i32, i32, i32, i32) {
    %c0_i32 = arith.constant 0 : i32
    %c0_i32_0 = arith.constant 0 : i32
    %c0_i32_1 = arith.constant 0 : i32
    return %arg0, %arg1, %c0_i32, %c0_i32_0 : i32, i32, i32, i32
  }
  func.func @transform_1(%arg0: i32, %arg1: i32) -> (i32, i32) {
    %c0_i32 = arith.constant 0 : i32
    %c0_i32_0 = arith.constant 0 : i32
    %c0_i32_1 = arith.constant 0 : i32
    return %c0_i32, %c0_i32_0 : i32, i32
  }
  func.func @transform_2(%arg0: i32, %arg1: i32) -> (i32, i32, i32) {
    %c0_i32 = arith.constant 0 : i32
    %c0_i32_0 = arith.constant 0 : i32
    return %arg0, %arg1, %c0_i32 : i32, i32, i32
  }
}

</mosaic_0001>

<bundles_post_ra>
// kernel: tpu_custom_call.1
= control target key start
LH: loop header
LB: loop body
LE: loop exit
PB: predicated region body
PF: predicated region fallthrough
CT: control target
= control target key end

     0   :  { %7 = vsyncpa [#allocation3], 0  ;;  %s1373_s0 = inlined_call_operand.hbm [shape: f32[2,1,16,128], index: 0, kind: input, shape index: {}]   ;;  %s1374_s1 = inlined_call_operand.hbm [shape: f32[256,512], index: 1, kind: input, shape index: {}]   ;;  %s1375_s2 = inlined_call_operand.hbm [shape: f32[2,1,8], index: 2, kind: output, shape index: {}]  }
   0x1   :  { %9 = vsyncpa [#allocation3 + $0x1], 0 }
   0x2   :  { %10 = vsyncpa [#allocation6], 0 }
   0x3   :  { %11 = vsyncpa [#allocation4], 0 }
   0x4   :  { %13 = vsyncpa [#allocation4 + $0x1], 0  ;;  %s1142_s9 = smov 0   ;;  %s1144_s10 = smov 0  }
   0x5   :  { %s1146_s11 = smov 0   ;;  %s1148_s12 = smov 0  }
   0x6   :  { %s1150_s13 = smov 0   ;;  %s1152_s14 = smov 0  }
   0x7 LB: > { %s744_s15 = sadd.s32 4294967295, %s1117_s14   ;;  %s745_s16 = sadd.s32 4294967294, %s1117_s14   ;;  %s1117_s14 = sphi %s1152_s14, %s19_s14   ;;  %s1113_s13 = sphi %s1150_s13, %s1399_s13   ;;  %s1109_s12 = sphi %s1148_s12, %s1398_s12   ;;  %s1105_s11 = sphi %s1146_s11, %s1397_s11   ;;  %s1101_s10 = sphi %s1144_s10, %s1396_s10   ;;  %s1097_s9 = sphi %s1142_s9, %s1395_s9  }
   0x8   : > { %p53_p0 = scmp.ne.s32.totalorder %s1101_s10, %s1097_s9  ;;  %p1176_p1 = scmp.eq.s32.totalorder %s744_s15, 0 }
   0x9   : > { %p1180_p2 = scmp.eq.s32.totalorder %s744_s15, 1  ;;  %p106_p3 = scmp.eq.s32.totalorder %s745_s16, 1 }
   0xa   : > { %s1380_s17 = scalar_select %p1176_p1, 1, 0 }
   0xb   : > { %s1381_s18 = scalar_select %p1180_p2, 1, 0 }
   0xc   : > { %p1186_p4 = por %p1176_p1, %p53_p0  ;;  %p746_p5 = scmp.ge.s32.totalorder %s1117_s14, 1 }
   0xd   : > { %p1191_p6 = por %p106_p3, %p53_p0  ;;  %p113_p7 = scmp.lt.s32.totalorder %s1117_s14, 3 }
   0xe   : > { %s1382_s19 = scalar_select %p1186_p4, 1, 0 }
   0xf   : > { %s1383_s20 = scalar_select %p1191_p6, 1, 0 }
  0x10   : > { %p1196_p8 = pnand %p746_p5, %p113_p7  ;;  %s1119_s22 = smov [#allocation5]  }
  0x11   : > { %s125_s23 = sshll.u32 %s1119_s22, 4  ;;  %s31_s25 = sadd.s32 1, %s1113_s13  ;;  %s126_s23 = int_to_ptr.vmem [resolvable:$true] %s125_s23 }
  0x12   : > { %s1384_s21 = scalar_select %p1196_p8, 1, 0 }
  0x13   : > { %p899_p9 = pneg %p1196_p8  ;;  %s973_s28 = scalar_lea.hbm %s1374_s1, 16384 }
  0x14   : > { %p974_p12 = scmp.ne.s32.totalorder %s1374_s1, %s973_s28  ;;  %p980_p5 = scmp.lt.u32.totalorder %s973_s28, %s1374_s1 }
  0x15   : > { %p1205_p11 = pnand %p899_p9, %p1176_p1 }
  0x17   : > { %p975_p13 = pneg %p1205_p11 }
  0x19   : > { %p976_p0 = pnand %p975_p13, %p974_p12 }
  0x1b   : > { %p977_p3 = pneg %p976_p0 }
  0x1d   : > { %p982_p7 = pnand %p980_p5, %p977_p3 }
  0x1f   : > { %985 = shalt.err (!%p982_p7)
}
  0x20   : > { %s986_s5 = scalar_lea.vmem %s126_s23, 16384  ;;  %p994_p1 = scmp.lt.s32.totalorder %s126_s23, %s126_s23 }
  0x21   : > { %p987_p9 = scmp.ne.s32.totalorder %s126_s23, %s986_s5  ;;  %p995_p4 = scmp.lt.s32.totalorder %s986_s5, %s986_s5 }
  0x23   : > { %p989_p10 = pnand %p987_p9, %p975_p13  ;;  %p996_p8 = por %p995_p4, %p994_p1 }
  0x25   : > { %p990_p6 = pneg %p989_p10 }
  0x27   : > { %p997_p2 = pnand %p996_p8, %p990_p6 }
  0x29   : > { %1000 = shalt.err (!%p997_p2)
}
  0x2a   : > { %s1120_s6 = smov 512   ;;  %s1121_s7 = smov 32  }
  0x2b   : > { %902 = dma.hbm_to_vmem [thread:$0]  (!%p1205_p11), %s1374_s1, 16384, %s126_s23, [#allocation6], %s1120_s6, %s1120_s6, %s1121_s7  }
  0x2c   : > { %p33_p1 = scmp.ge.s32.totalorder %s31_s25, 2  ;;  %s40_s16 = sadd.s32 1, %s1105_s11 }
  0x2d   : > { %p47_p2 = scmp.ne.s32.totalorder %s1105_s11, %s1101_s10  ;;  %p48_p4 = scmp.eq.s32.totalorder %s1117_s14, 0 }
  0x2e   : > { %s1401_s25 = smov (%p33_p1, %s31_s25), 0  ;;  %p1387_p8 = scmp.ne.s32.totalorder %s1381_s18, 0 }
  0x2f   : > { %p1232_p6 = por %p48_p4, %p47_p2  ;;  %s35_s24 = ssub.s32 %s1113_s13, %s1401_s25 }
  0x30   : > { %p1238_p10 = por %p1387_p8, %p47_p2  ;;  %p912_p12 = scmp.lt.s32.totalorder %s1117_s14, 2 }
  0x31   : > { %p38_p11 = scmp.eq.s32.totalorder %s35_s24, 0  ;;  %s139_s23 = sand.u32 1, %s1105_s11  }
  0x32   : > { %s749_s27 = sshll.u32 %s139_s23, 4  ;;  %s758_s29 = sshll.u32 %s1113_s13, 8 }
  0x33   : > { %s1247_s28 = scalar_select %p38_p11, %s1105_s11, %s40_s16  }
  0x34   : > { %s1253_s4 = scalar_lea.hbm %s1373_s0, %s758_s29  ;;  %s143_s18 = scalar_lea.vmem [#allocation2], %s749_s27 }
  0x35   : > { %s152_s5 = sshll.u32 %s143_s18, 4  ;;  %p1259_p13 = pnand %p912_p12, %p1232_p6  ;;  %s1255_s5 = int_to_ptr.vmem [resolvable:$true] %s152_s5 }
  0x36   : > { %s1263_s7 = scalar_lea.sflag [#allocation3], %s139_s23  ;;  %s1001_s8 = scalar_lea.hbm %s1253_s4, 256 }
  0x37   : > { %p1002_p0 = scmp.ne.s32.totalorder %s1253_s4, %s1001_s8  ;;  %p1003_p3 = pneg %p1259_p13 }
  0x38   : > { %s1006_s22 = scalar_lea.hbm %s1373_s0, 512  ;;  %p1007_p9 = scmp.lt.u32.totalorder %s1253_s4, %s1373_s0 }
  0x39   : > { %p1004_p5 = pnand %p1003_p3, %p1002_p0  ;;  %p1008_p1 = scmp.lt.u32.totalorder %s1006_s22, %s1001_s8 }
  0x3a   : > { %p1010_p4 = scmp.lt.u32.totalorder %s1001_s8, %s1253_s4 }
  0x3b   : > { %p1005_p7 = pneg %p1004_p5  ;;  %p1009_p2 = por %p1008_p1, %p1007_p9 }
  0x3d   : > { %p1011_p6 = por %p1010_p4, %p1009_p2 }
  0x3f   : > { %p1012_p8 = pnand %p1011_p6, %p1005_p7 }
  0x41   : > { %1015 = shalt.err (!%p1012_p8)
}
  0x42   : > { %s1016_s23 = scalar_lea.vmem %s1255_s5, 256  ;;  %s1122_s29 = smov [#allocation2]  }
  0x43   : > { %p1017_p12 = scmp.ne.s32.totalorder %s1255_s5, %s1016_s23  ;;  %s1021_s30 = sshll.u32 %s1122_s29, 4  ;;  %s1022_s30 = int_to_ptr.vmem [resolvable:$false] %s1021_s30 }
  0x44   : > { %s1023_s3 = scalar_lea.vmem %s1022_s30, 512  ;;  %p1024_p5 = scmp.lt.s32.totalorder %s1255_s5, %s1022_s30 }
  0x45   : > { %p1019_p11 = pnand %p1017_p12, %p1003_p3  ;;  %p1025_p9 = scmp.lt.s32.totalorder %s1023_s3, %s1016_s23 }
  0x47   : > { %p1020_p0 = pneg %p1019_p11  ;;  %p1026_p1 = por %p1025_p9, %p1024_p5 }
  0x49   : > { %p1027_p2 = pnand %p1026_p1, %p1020_p0 }
  0x4b   : > { %1030 = shalt.err (!%p1027_p2)
}
  0x4c   : > { %s1123_s18 = smov 128   ;;  %s1124_s8 = smov 8  }
  0x4d   : > { %906 = dma.hbm_to_vmem [thread:$0]  (!%p1259_p13), %s1253_s4, 256, %s1255_s5, %s1263_s7, %s1123_s18, %s1123_s18, %s1124_s8  }
  0x4e   : > { %p1390_p3 = scmp.ne.s32.totalorder %s1384_s21, 0 }
  0x4f   : > { %s1294_s15 = sand.u32 (!%p1390_p3), 1, %s1101_s10   ;;  %p1391_p7 = scmp.ne.s32.totalorder (!%p1390_p3), %s1382_s19, 0 }
  0x50   : > { %164 = sbr.rel (%p1390_p3) target bundleno = 556 (0x22c), region = 28  ;;  %s753_s16 = sshll.u32 (!%p1390_p3), %s1294_s15, 4 }
  0x51   : > { %s167_s22 = scalar_lea.sflag (!%p1390_p3), [#allocation3], %s1294_s15  ;;  %s1298_s24 = scalar_lea.vmem (!%p1390_p3), [#allocation2], %s753_s16 }
  0x57   : > { %1084 = dma.done.wait (%p1391_p7), %s167_s22, 256  }
  0x58   : > { %1086 = vsyncadd (%p1391_p7), %s167_s22, 4294967040  ;;  %p1392_p13 = scmp.ne.s32.totalorder %s1380_s17, 0 }
  0x5a   : > { %1088 = dma.done.wait (%p1392_p13), [#allocation6], 16384  }
  0x5b   : > { %1090 = vsyncadd (%p1392_p13), [#allocation6], 4294950912  ;;  %v1125_v0 = vmov 0.0   ;;  %v261_v1 = vld [vmem:[#allocation5 + $0x208] sm:$0xff]  ;;  %v263_v3 = vld [vmem:[#allocation5 + $0x218] sm:$0xff]  ;;  %vm326_vm0 = vcmask 1046528  }
  0x5c   : > { %395 = vmatprep.mubr.f32.mxu0 %v1125_v0  ;;  %466 = vmatprep.mubr.f32.mxu1 %v1125_v0  ;;  %v265_v2 = vld [vmem:[#allocation5 + $0x228] sm:$0xff]  ;;  %v267_v5 = vld [vmem:[#allocation5 + $0x238] sm:$0xff]  ;;  %v260_v6 = vld [vmem:[#allocation5 + $0x200] sm:$0xff]  ;;  %s755_s17 = sshll.u32 %s1109_s12, 4  ;;  %s193_s19 = scalar_lea.vmem [#allocation7], %s1294_s15  ;;  %vm640_vm1 = vcmask 57344  }
  0x5d   : > { %v759_v4 = vpack.c.bf16 %v265_v2, %v261_v1  ;;  %v264_v7 = vld [vmem:[#allocation5 + $0x220] sm:$0xff]  ;;  %v791_v8 = vpack.c.bf16 %v267_v5, %v263_v3  ;;  %v262_v10 = vld [vmem:[#allocation5 + $0x210] sm:$0xff]  ;;  %v269_v12 = vld [vmem:[#allocation5 + $0x248] sm:$0xff]  ;;  %s656_s21 = sshll.u32 %s193_s19, 4  ;;  %s1324_s6 = scalar_lea.hbm %s1375_s2, %s755_s17  ;;  %s1326_s21 = int_to_ptr.vmem [resolvable:$true] %s656_s21 }
  0x5e   : > { %v761_v9 = vpack.c.bf16 %v264_v7, %v260_v6  ;;  %v266_v11 = vld [vmem:[#allocation5 + $0x230] sm:$0xff]  ;;  %v273_v14 = vld [vmem:[#allocation5 + $0x268] sm:$0xff]  ;;  %v271_v15 = vld [vmem:[#allocation5 + $0x258] sm:$0xff]  ;;  %s643_s7 = scalar_lea.sflag [#allocation4], %s1294_s15  ;;  %s1031_s27 = scalar_lea.vmem %s1326_s21, 16 }
  0x5f   : > { %760 = vmatprep.subr.bf16.mxu0 %v759_v4  ;;  %v793_v13 = vpack.c.bf16 %v266_v11, %v262_v10  ;;  %v275_v16 = vld [vmem:[#allocation5 + $0x278] sm:$0xff]  ;;  %792 = vmatprep.subr.bf16.mxu1 %v791_v8  ;;  %v763_v17 = vpack.c.bf16 %v273_v14, %v269_v12  ;;  %v268_v19 = vld [vmem:[#allocation5 + $0x240] sm:$0xff]  ;;  %v270_v21 = vld [vmem:[#allocation5 + $0x250] sm:$0xff]  ;;  %p1032_p4 = scmp.ne.s32.totalorder %s1326_s21, %s1031_s27  ;;  %s1126_s12 = smov [#allocation7]  }
  0x60   : > { %762 = vmatpush1.bf16.msra.mxu0 %v761_v9  ;;  %v795_v18 = vpack.c.bf16 %v275_v16, %v271_v15  ;;  %v272_v20 = vld [vmem:[#allocation5 + $0x260] sm:$0xff]  ;;  %v274_v23 = vld [vmem:[#allocation5 + $0x270] sm:$0xff]  ;;  %v277_v24 = vld [vmem:[#allocation5 + $0x288] sm:$0xff]  ;;  %s1035_s23 = sshll.u32 %s1126_s12, 4  ;;  %s1036_s23 = int_to_ptr.vmem [resolvable:$false] %s1035_s23 }
  0x61   : > { %794 = vmatpush1.bf16.msra.mxu1 %v793_v13  ;;  %v765_v22 = vpack.c.bf16 %v272_v20, %v268_v19  ;;  %v281_v25 = vld [vmem:[#allocation5 + $0x2a8] sm:$0xff]  ;;  %764 = vmatprep.subr.bf16.mxu0 %v763_v17  ;;  %v797_v26 = vpack.c.bf16 %v274_v23, %v270_v21  ;;  %v279_v28 = vld [vmem:[#allocation5 + $0x298] sm:$0xff]  ;;  %v276_v30 = vld [vmem:[#allocation5 + $0x280] sm:$0xff]  ;;  %p1033_p6 = pnand %p1032_p4, %p1238_p10  ;;  %s1037_s29 = scalar_lea.vmem %s1036_s23, 32 }
  0x62   : > { %796 = vmatprep.subr.bf16.mxu1 %v795_v18  ;;  %v767_v27 = vpack.c.bf16 %v281_v25, %v277_v24  ;;  %v283_v29 = vld [vmem:[#allocation5 + $0x2b8] sm:$0xff]  ;;  %v280_v32 = vld [vmem:[#allocation5 + $0x2a0] sm:$0xff]  ;;  %v278_v33 = vld [vmem:[#allocation5 + $0x290] sm:$0xff]  ;;  %p1038_p12 = scmp.lt.s32.totalorder %s1326_s21, %s1036_s23  ;;  %p1039_p11 = scmp.lt.s32.totalorder %s1037_s29, %s1031_s27 }
  0x63   : > { %v799_v31 = vpack.c.bf16 %v283_v29, %v279_v28  ;;  %v282_v34 = vld [vmem:[#allocation5 + $0x2b0] sm:$0xff]  ;;  %v769_v35 = vpack.c.bf16 %v280_v32, %v276_v30  ;;  %v285_v36 = vld [vmem:[#allocation5 + $0x2c8] sm:$0xff]  ;;  %v287_v38 = vld [vmem:[#allocation5 + $0x2d8] sm:$0xff]  ;;  %p1034_p8 = pneg %p1033_p6 }
  0x64   : > { %766 = vmatpush1.bf16.msra.mxu0 %v765_v22  ;;  %v289_v37 = vld [vmem:[#allocation5 + $0x2e8] sm:$0xff]  ;;  %v801_v39 = vpack.c.bf16 %v282_v34, %v278_v33  ;;  %v291_v41 = vld [vmem:[#allocation5 + $0x2f8] sm:$0xff]  ;;  %v284_v42 = vld [vmem:[#allocation5 + $0x2c0] sm:$0xff]  ;;  %p1040_p0 = por %p1039_p11, %p1038_p12 }
  0x65   : > { %798 = vmatpush1.bf16.msra.mxu1 %v797_v26  ;;  %768 = vmatprep.subr.bf16.mxu0 %v767_v27  ;;  %v771_v40 = vpack.c.bf16 %v289_v37, %v285_v36  ;;  %v288_v43 = vld [vmem:[#allocation5 + $0x2e0] sm:$0xff]  ;;  %v803_v44 = vpack.c.bf16 %v291_v41, %v287_v38  ;;  %v286_v45 = vld [vmem:[#allocation5 + $0x2d0] sm:$0xff]  ;;  %v293_v47 = vld [vmem:[#allocation5 + $0x308] sm:$0xff] }
  0x66   : > { %800 = vmatprep.subr.bf16.mxu1 %v799_v31  ;;  %v290_v46 = vld [vmem:[#allocation5 + $0x2f0] sm:$0xff]  ;;  %v297_v48 = vld [vmem:[#allocation5 + $0x328] sm:$0xff]  ;;  %v295_v49 = vld [vmem:[#allocation5 + $0x318] sm:$0xff]  ;;  %v773_v51 = vpack.c.bf16 %v288_v43, %v284_v42  ;;  %p1041_p5 = pnand %p1040_p0, %p1034_p8 }
  0x67   : > { %v299_v50 = vld [vmem:[#allocation5 + $0x338] sm:$0xff]  ;;  %v805_v52 = vpack.c.bf16 %v290_v46, %v286_v45  ;;  %v775_v53 = vpack.c.bf16 %v297_v48, %v293_v47  ;;  %v292_v54 = vld [vmem:[#allocation5 + $0x300] sm:$0xff]  ;;  %v294_v56 = vld [vmem:[#allocation5 + $0x310] sm:$0xff] }
  0x68   : > { %770 = vmatpush1.bf16.msra.mxu0 %v769_v35  ;;  %v296_v55 = vld [vmem:[#allocation5 + $0x320] sm:$0xff]  ;;  %v807_v57 = vpack.c.bf16 %v299_v50, %v295_v49  ;;  %v298_v58 = vld [vmem:[#allocation5 + $0x330] sm:$0xff]  ;;  %v301_v59 = vld [vmem:[#allocation5 + $0x348] sm:$0xff] }
  0x69   : > { %802 = vmatpush1.bf16.msra.mxu1 %v801_v39  ;;  %772 = vmatprep.subr.bf16.mxu0 %v771_v40  ;;  %v305_v60 = vld [vmem:[#allocation5 + $0x368] sm:$0xff]  ;;  %v303_v61 = vld [vmem:[#allocation5 + $0x358] sm:$0xff]  ;;  %v777_v63 = vpack.c.bf16 %v296_v55, %v292_v54  ;;  %v809_v1 = vpack.c.bf16 %v298_v58, %v294_v56  ;;  %v300_v3 = vld [vmem:[#allocation5 + $0x340] sm:$0xff] }
  0x6a   : > { %804 = vmatprep.subr.bf16.mxu1 %v803_v44  ;;  %v307_v62 = vld [vmem:[#allocation5 + $0x378] sm:$0xff]  ;;  %v779_v2 = vpack.c.bf16 %v305_v60, %v301_v59  ;;  %v304_v4 = vld [vmem:[#allocation5 + $0x360] sm:$0xff]  ;;  %v302_v5 = vld [vmem:[#allocation5 + $0x350] sm:$0xff] }
  0x6b   : > { %v811_v6 = vpack.c.bf16 %v307_v62, %v303_v61  ;;  %v306_v7 = vld [vmem:[#allocation5 + $0x370] sm:$0xff]  ;;  %v309_v8 = vld [vmem:[#allocation5 + $0x388] sm:$0xff]  ;;  %v311_v10 = vld [vmem:[#allocation5 + $0x398] sm:$0xff]  ;;  %v781_v12 = vpack.c.bf16 %v304_v4, %v300_v3 }
  0x6c   : > { %774 = vmatpush1.bf16.msra.mxu0 %v773_v51  ;;  %v313_v9 = vld [vmem:[#allocation5 + $0x3a8] sm:$0xff]  ;;  %v315_v11 = vld [vmem:[#allocation5 + $0x3b8] sm:$0xff]  ;;  %v813_v13 = vpack.c.bf16 %v306_v7, %v302_v5  ;;  %v308_v15 = vld [vmem:[#allocation5 + $0x380] sm:$0xff] }
  0x6d   : > { %806 = vmatpush1.bf16.msra.mxu1 %v805_v52  ;;  %776 = vmatprep.subr.bf16.mxu0 %v775_v53  ;;  %v783_v14 = vpack.c.bf16 %v313_v9, %v309_v8  ;;  %v312_v16 = vld [vmem:[#allocation5 + $0x3a0] sm:$0xff]  ;;  %v310_v17 = vld [vmem:[#allocation5 + $0x390] sm:$0xff]  ;;  %v815_v18 = vpack.c.bf16 %v315_v11, %v311_v10  ;;  %v317_v20 = vld [vmem:[#allocation5 + $0x3c8] sm:$0xff] }
  0x6e   : > { %808 = vmatprep.subr.bf16.mxu1 %v807_v57  ;;  %v314_v19 = vld [vmem:[#allocation5 + $0x3b0] sm:$0xff]  ;;  %v321_v21 = vld [vmem:[#allocation5 + $0x3e8] sm:$0xff]  ;;  %v319_v22 = vld [vmem:[#allocation5 + $0x3d8] sm:$0xff]  ;;  %v785_v24 = vpack.c.bf16 %v312_v16, %v308_v15 }
  0x6f   : > { %v323_v23 = vld [vmem:[#allocation5 + $0x3f8] sm:$0xff]  ;;  %v316_v25 = vld [vmem:[#allocation5 + $0x3c0] sm:$0xff]  ;;  %v817_v27 = vpack.c.bf16 %v314_v19, %v310_v17  ;;  %v787_v28 = vpack.c.bf16 %v321_v21, %v317_v20  ;;  %v318_v29 = vld [vmem:[#allocation5 + $0x3d0] sm:$0xff] }
  0x70   : > { %778 = vmatpush1.bf16.msra.mxu0 %v777_v63  ;;  %v320_v26 = vld [vmem:[#allocation5 + $0x3e0] sm:$0xff]  ;;  %v195_v31 = vld [vmem:[%s1298_s24 + $0x8] sm:$0xff]  ;;  %v819_v32 = vpack.c.bf16 %v323_v23, %v319_v22  ;;  %v322_v33 = vld [vmem:[#allocation5 + $0x3f0] sm:$0xff] }
  0x71   : > { %810 = vmatpush1.bf16.msra.mxu1 %v809_v1  ;;  %780 = vmatprep.subr.bf16.mxu0 %v779_v2  ;;  %v1311_v30 = vld [vmem:[%s1298_s24] sm:$0xff]  ;;  %v197_v34 = vld [vmem:[#allocation5 + $0x8] sm:$0xff]  ;;  %v199_v36 = vld [vmem:[#allocation5 + $0x18] sm:$0xff]  ;;  %v789_v38 = vpack.c.bf16 %v320_v26, %v316_v25  ;;  %v328_v40 = vrot.slane %v195_v31, 1  ;;  %v821_v41 = vpack.c.bf16 %v322_v33, %v318_v29 }
  0x72   : > { %812 = vmatprep.subr.bf16.mxu1 %v811_v6  ;;  %v201_v35 = vld [vmem:[#allocation5 + $0x28] sm:$0xff]  ;;  %v203_v37 = vld [vmem:[#allocation5 + $0x38] sm:$0xff]  ;;  %v327_v39 = vrot.slane %v1311_v30, 1  ;;  %v196_v43 = vld [vmem:[#allocation5] sm:$0xff] }
  0x73   : > { %v823_v42 = vpack.c.bf16 %v201_v35, %v197_v34  ;;  %v200_v44 = vld [vmem:[#allocation5 + $0x20] sm:$0xff]  ;;  %v198_v45 = vld [vmem:[#allocation5 + $0x10] sm:$0xff]  ;;  %v855_v46 = vpack.c.bf16 %v203_v37, %v199_v36  ;;  %v205_v48 = vld [vmem:[#allocation5 + $0x48] sm:$0xff] }
  0x74   : > { %782 = vmatpush1.bf16.msra.mxu0 %v781_v12  ;;  %v202_v47 = vld [vmem:[#allocation5 + $0x30] sm:$0xff]  ;;  %v209_v49 = vld [vmem:[#allocation5 + $0x68] sm:$0xff]  ;;  %v207_v50 = vld [vmem:[#allocation5 + $0x58] sm:$0xff]  ;;  %v329_v52 = vsel %vm326_vm0, %v327_v39, %v328_v40  ;;  %v825_v53 = vpack.c.bf16 %v200_v44, %v196_v43 }
  0x75   : > { %814 = vmatpush1.bf16.msra.mxu1 %v813_v13  ;;  %784 = vmatprep.subr.bf16.mxu0 %v783_v14  ;;  %v211_v51 = vld [vmem:[#allocation5 + $0x78] sm:$0xff]  ;;  %v857_v54 = vpack.c.bf16 %v202_v47, %v198_v45  ;;  %v827_v55 = vpack.c.bf16 %v209_v49, %v205_v48  ;;  %v204_v56 = vld [vmem:[#allocation5 + $0x40] sm:$0xff]  ;;  %v206_v58 = vld [vmem:[#allocation5 + $0x50] sm:$0xff] }
  0x76   : > { %816 = vmatprep.subr.bf16.mxu1 %v815_v18  ;;  %v208_v57 = vld [vmem:[#allocation5 + $0x60] sm:$0xff]  ;;  %v859_v59 = vpack.c.bf16 %v211_v51, %v207_v50  ;;  %v210_v60 = vld [vmem:[#allocation5 + $0x70] sm:$0xff]  ;;  %v213_v61 = vld [vmem:[#allocation5 + $0x88] sm:$0xff] }
  0x77   : > { %v217_v62 = vld [vmem:[#allocation5 + $0xa8] sm:$0xff]  ;;  %v215_v63 = vld [vmem:[#allocation5 + $0x98] sm:$0xff]  ;;  %v829_v2 = vpack.c.bf16 %v208_v57, %v204_v56  ;;  %v861_v3 = vpack.c.bf16 %v210_v60, %v206_v58  ;;  %v212_v5 = vld [vmem:[#allocation5 + $0x80] sm:$0xff] }
  0x78   : > { %786 = vmatpush1.bf16.msra.mxu0 %v785_v24  ;;  %v219_v1 = vld [vmem:[#allocation5 + $0xb8] sm:$0xff]  ;;  %v831_v4 = vpack.c.bf16 %v217_v62, %v213_v61  ;;  %v216_v6 = vld [vmem:[#allocation5 + $0xa0] sm:$0xff]  ;;  %v214_v7 = vld [vmem:[#allocation5 + $0x90] sm:$0xff] }
  0x79   : > { %818 = vmatpush1.bf16.msra.mxu1 %v817_v27  ;;  %788 = vmatprep.subr.bf16.mxu0 %v787_v28  ;;  %v863_v8 = vpack.c.bf16 %v219_v1, %v215_v63  ;;  %v218_v9 = vld [vmem:[#allocation5 + $0xb0] sm:$0xff]  ;;  %v221_v10 = vld [vmem:[#allocation5 + $0xc8] sm:$0xff]  ;;  %v223_v12 = vld [vmem:[#allocation5 + $0xd8] sm:$0xff]  ;;  %v833_v14 = vpack.c.bf16 %v216_v6, %v212_v5 }
  0x7a   : > { %820 = vmatprep.subr.bf16.mxu1 %v819_v32  ;;  %v225_v11 = vld [vmem:[#allocation5 + $0xe8] sm:$0xff]  ;;  %v227_v13 = vld [vmem:[#allocation5 + $0xf8] sm:$0xff]  ;;  %v865_v15 = vpack.c.bf16 %v218_v9, %v214_v7  ;;  %v220_v17 = vld [vmem:[#allocation5 + $0xc0] sm:$0xff] }
  0x7b   : > { %v835_v16 = vpack.c.bf16 %v225_v11, %v221_v10  ;;  %v224_v18 = vld [vmem:[#allocation5 + $0xe0] sm:$0xff]  ;;  %v222_v19 = vld [vmem:[#allocation5 + $0xd0] sm:$0xff]  ;;  %v867_v20 = vpack.c.bf16 %v227_v13, %v223_v12  ;;  %v229_v22 = vld [vmem:[#allocation5 + $0x108] sm:$0xff] }
  0x7c   : > { %790 = vmatpush1.bf16.msra.mxu0 %v789_v38  ;;  %v226_v21 = vld [vmem:[#allocation5 + $0xf0] sm:$0xff]  ;;  %v233_v23 = vld [vmem:[#allocation5 + $0x128] sm:$0xff]  ;;  %v231_v24 = vld [vmem:[#allocation5 + $0x118] sm:$0xff]  ;;  %v837_v26 = vpack.c.bf16 %v224_v18, %v220_v17 }
  0x7d   : > { %822 = vmatpush1.bf16.msra.mxu1 %v821_v41  ;;  %824 = vmatprep.subr.bf16.mxu0 %v823_v42  ;;  %v235_v25 = vld [vmem:[#allocation5 + $0x138] sm:$0xff]  ;;  %v839_v27 = vpack.c.bf16 %v233_v23, %v229_v22  ;;  %v228_v28 = vld [vmem:[#allocation5 + $0x100] sm:$0xff]  ;;  %v230_v31 = vld [vmem:[#allocation5 + $0x110] sm:$0xff] }
  0x7e   : > { %856 = vmatprep.subr.bf16.mxu1 %v855_v46  ;;  %v232_v29 = vld [vmem:[#allocation5 + $0x120] sm:$0xff]  ;;  %v871_v32 = vpack.c.bf16 %v235_v25, %v231_v24  ;;  %v234_v33 = vld [vmem:[#allocation5 + $0x130] sm:$0xff]  ;;  %v237_v34 = vld [vmem:[#allocation5 + $0x148] sm:$0xff]  ;;  %v633_v25 = vlaneseq }
  0x7f   : > { %396 = vmatmul.mubr.f32.vlgmr.msra.gmra.mrb[0].mxu0 %v329_v52  ;;  %v241_v35 = vld [vmem:[#allocation5 + $0x168] sm:$0xff]  ;;  %v239_v36 = vld [vmem:[#allocation5 + $0x158] sm:$0xff]  ;;  %v841_v38 = vpack.c.bf16 %v232_v29, %v228_v28  ;;  %v873_v39 = vpack.c.bf16 %v234_v33, %v230_v31  ;;  %v236_v41 = vld [vmem:[#allocation5 + $0x140] sm:$0xff] }
  0x80   : > { %467 = vmatmul.mubr.f32.vlgmr.msra.gmra.mrb[0].mxu1 %v329_v52  ;;  %826 = vmatpush1.bf16.msra.mxu0 %v825_v53  ;;  %v243_v37 = vld [vmem:[#allocation5 + $0x178] sm:$0xff]  ;;  %v843_v40 = vpack.c.bf16 %v241_v35, %v237_v34  ;;  %v240_v42 = vld [vmem:[#allocation5 + $0x160] sm:$0xff]  ;;  %v238_v43 = vld [vmem:[#allocation5 + $0x150] sm:$0xff] }
  0x81   : > { %858 = vmatpush1.bf16.msra.mxu1 %v857_v54  ;;  %828 = vmatprep.subr.bf16.mxu0 %v827_v55  ;;  %v875_v44 = vpack.c.bf16 %v243_v37, %v239_v36  ;;  %v242_v45 = vld [vmem:[#allocation5 + $0x170] sm:$0xff]  ;;  %v245_v46 = vld [vmem:[#allocation5 + $0x188] sm:$0xff]  ;;  %v247_v48 = vld [vmem:[#allocation5 + $0x198] sm:$0xff]  ;;  %v845_v50 = vpack.c.bf16 %v240_v42, %v236_v41 }
  0x82   : > { %860 = vmatprep.subr.bf16.mxu1 %v859_v59  ;;  %537 = vmatprep.mubr.f32.mxu0 %v1125_v0  ;;  %v249_v47 = vld [vmem:[#allocation5 + $0x1a8] sm:$0xff]  ;;  %v251_v49 = vld [vmem:[#allocation5 + $0x1b8] sm:$0xff]  ;;  %v877_v51 = vpack.c.bf16 %v242_v45, %v238_v43  ;;  %v244_v53 = vld [vmem:[#allocation5 + $0x180] sm:$0xff] }
  0x83   : > { %608 = vmatprep.mubr.f32.mxu1 %v1125_v0  ;;  %v869_v0 = vpack.c.bf16 %v226_v21, %v222_v19  ;;  %v847_v52 = vpack.c.bf16 %v249_v47, %v245_v46  ;;  %v248_v54 = vld [vmem:[#allocation5 + $0x1a0] sm:$0xff]  ;;  %v246_v55 = vld [vmem:[#allocation5 + $0x190] sm:$0xff]  ;;  %v879_v56 = vpack.c.bf16 %v251_v49, %v247_v48  ;;  %v253_v58 = vld [vmem:[#allocation5 + $0x1c8] sm:$0xff] }
  0x84   : > { %830 = vmatpush1.bf16.msra.mxu0 %v829_v2  ;;  %v250_v57 = vld [vmem:[#allocation5 + $0x1b0] sm:$0xff]  ;;  %v257_v59 = vld [vmem:[#allocation5 + $0x1e8] sm:$0xff]  ;;  %v255_v60 = vld [vmem:[#allocation5 + $0x1d8] sm:$0xff]  ;;  %v849_v62 = vpack.c.bf16 %v248_v54, %v244_v53 }
  0x85   : > { %862 = vmatpush1.bf16.msra.mxu1 %v861_v3  ;;  %832 = vmatprep.subr.bf16.mxu0 %v831_v4  ;;  %v259_v61 = vld [vmem:[#allocation5 + $0x1f8] sm:$0xff]  ;;  %v881_v63 = vpack.c.bf16 %v250_v57, %v246_v55  ;;  %v851_v1 = vpack.c.bf16 %v257_v59, %v253_v58  ;;  %v252_v2 = vld [vmem:[#allocation5 + $0x1c0] sm:$0xff]  ;;  %v254_v5 = vld [vmem:[#allocation5 + $0x1d0] sm:$0xff] }
  0x86   : > { %864 = vmatprep.subr.bf16.mxu1 %v863_v8  ;;  %v256_v3 = vld [vmem:[#allocation5 + $0x1e0] sm:$0xff]  ;;  %v883_v4 = vpack.c.bf16 %v259_v61, %v255_v60  ;;  %v258_v6 = vld [vmem:[#allocation5 + $0x1f0] sm:$0xff] }
  0x87   : > { %v853_v7 = vpack.c.bf16 %v256_v3, %v252_v2  ;;  %v885_v8 = vpack.c.bf16 %v258_v6, %v254_v5 }
  0x88   : > { %834 = vmatpush1.bf16.msra.mxu0 %v833_v14 }
  0x89   : > { %866 = vmatpush1.bf16.msra.mxu1 %v865_v15  ;;  %836 = vmatprep.subr.bf16.mxu0 %v835_v16 }
  0x8a   : > { %868 = vmatprep.subr.bf16.mxu1 %v867_v20 }
  0x8c   : > { %838 = vmatpush1.bf16.msra.mxu0 %v837_v26  ;;  %v634_v26 = vand.u32 127, %v633_v25 }
  0x8d   : > { %870 = vmatpush1.bf16.msra.mxu1 %v869_v0  ;;  %840 = vmatprep.subr.bf16.mxu0 %v839_v27  ;;  %v636_v0 = vshrl.u32 %v633_v25, 7 }
  0x8e   : > { %872 = vmatprep.subr.bf16.mxu1 %v871_v32 }
  0x8f   : > { %v637_v29 = vsub.s32 %v634_v26, %v636_v0 }
  0x90   : > { %842 = vmatpush1.bf16.msra.mxu0 %v841_v38 }
  0x91   : > { %874 = vmatpush1.bf16.msra.mxu1 %v873_v39  ;;  %844 = vmatprep.subr.bf16.mxu0 %v843_v40 }
  0x92   : > { %876 = vmatprep.subr.bf16.mxu1 %v875_v44 }
  0x94   : > { %846 = vmatpush1.bf16.msra.mxu0 %v845_v50 }
  0x95   : > { %878 = vmatpush1.bf16.msra.mxu1 %v877_v51  ;;  %848 = vmatprep.subr.bf16.mxu0 %v847_v52 }
  0x96   : > { %880 = vmatprep.subr.bf16.mxu1 %v879_v56 }
  0x98   : > { %850 = vmatpush1.bf16.msra.mxu0 %v849_v62 }
  0x99   : > { %882 = vmatpush1.bf16.msra.mxu1 %v881_v63  ;;  %852 = vmatprep.subr.bf16.mxu0 %v851_v1 }
  0x9a   : > { %884 = vmatprep.subr.bf16.mxu1 %v883_v4 }
  0x9c   : > { %854 = vmatpush1.bf16.msra.mxu0 %v853_v7 }
  0x9d   : > { %886 = vmatpush1.bf16.msra.mxu1 %v885_v8 }
  0x9f   : > { %538 = vmatmul.mubr.f32.vlgmr.msra.gmra.mrb[0].mxu0 %v1311_v30 }
  0xa0   : > { %609 = vmatmul.mubr.f32.vlgmr.msra.gmra.mrb[0].mxu1 %v1311_v30 }
 0x172   : > { %v539_v9 = vpop.f32.mrb[0].mxu0 }
 0x173   : > { %v615_v10 = vmul.f32 %v539_v9, %v539_v9  ;;  %v610_v11 = vpop.f32.mrb[0].mxu1  ;;  %v541_v12 = vpop.f32.mrb[1].mxu0 }
 0x174   : > { %v617_v13 = vmul.f32 %v610_v11, %v610_v11  ;;  %v616_v14 = vmul.f32 %v541_v12, %v541_v12  ;;  %v612_v15 = vpop.f32.mrb[1].mxu1 }
 0x175   : > { %v618_v16 = vmul.f32 %v612_v15, %v612_v15 }
 0x176   : > { %v619_v17 = vadd.f32 %v617_v13, %v615_v10 }
 0x177   : > { %v620_v18 = vadd.f32 %v618_v16, %v616_v14 }
 0x178   : > { %v621_v19 = vadd.f32 1e-14, %v619_v17 }
 0x179   : > { %v622_v20 = vadd.f32 1e-14, %v620_v18 }
 0x17a   : > { %969 = vlog2.f32 %v621_v19 }
 0x17b   : > { %971 = vlog2.f32 %v622_v20 }
 0x184   : > { %v970_v21 = vpop.eup %969 }
 0x185   : > { %v972_v22 = vpop.eup %971  ;;  %v624_v23 = vmul.f32 0.6931472, %v970_v21 }
 0x186   : > { %v626_v30 = vmul.f32 0.6931472, %v972_v22 }
 0x188   : > { %v627_v24 = vadd.f32 %v626_v30, %v624_v23 }
 0x18a   : > { %628 = vadd.xlane.f32.xlu0 %v627_v24 }
 0x217   : > { %v629_v27 = vpop.xlane.xlu0 %628 }
 0x218   : > { %v630_v28 = vmul.f32 0.003875969, %v629_v27 }
 0x21a   : > { %v631_v31 = vadd.f32 14.937369, %v630_v28 }
 0x21c   : > { %v638_v32 = vrot.slane %v631_v31, %v637_v29 }
 0x21e   : > { %641 = vst.msk [vmem:[%s193_s19] sm:$0x1] %vm640_vm1, %v638_v32 }
 0x21f   : > { %1044 = shalt.err (!%p1041_p5)
}
 0x220   : > { %s1045_s30 = scalar_lea.hbm %s1324_s6, 16  ;;  %s1049_s8 = scalar_lea.hbm %s1375_s2, 32 }
 0x221   : > { %p1046_p9 = scmp.ne.s32.totalorder %s1324_s6, %s1045_s30  ;;  %p1050_p3 = scmp.lt.u32.totalorder %s1324_s6, %s1375_s2 }
 0x222   : > { %p1051_p7 = scmp.lt.u32.totalorder %s1049_s8, %s1045_s30  ;;  %p1053_p4 = scmp.lt.u32.totalorder %s1045_s30, %s1324_s6 }
 0x223   : > { %p1047_p1 = pnand %p1046_p9, %p1238_p10 }
 0x224   : > { %p1052_p13 = por %p1051_p7, %p1050_p3 }
 0x225   : > { %p1048_p2 = pneg %p1047_p1 }
 0x226   : > { %p1054_p6 = por %p1053_p4, %p1052_p13 }
 0x228   : > { %p1055_p8 = pnand %p1054_p6, %p1048_p2 }
 0x22a   : > { %1058 = shalt.err (!%p1055_p8)
}
 0x22b   : > { %897 = dma.vmem_to_hbm [thread:$0]  (%p1238_p10), %s1326_s21, 16, %s1324_s6, %s643_s7  }
 0x22c PF: > { %s668_s22 = sand.u32 1, %s1097_s9   ;;  %p1393_p12 = scmp.ne.s32.totalorder %s1383_s20, 0 }
 0x22d   : > { %p1394_p11 = scmp.ge.s32.totalorder %s1117_s14, 2  ;;  %s669_s24 = scalar_lea.sflag [#allocation4], %s668_s22 }
 0x22f   : > { %p908_p0 = pnand %p1394_p11, %p1393_p12 }
 0x231   : > { %1092 = dma.done.wait (!%p908_p0), %s669_s24, 16  }
 0x232   : > { %1094 = vsyncadd (!%p908_p0), %s669_s24, 4294967280  ;;  %s19_s14 = sadd.s32 1, %s1117_s14   ;;  %s1395_s9 = smov %s1101_s10 }
 0x233   : > { %p16_p5 = scmp.ge.s32.totalorder %s19_s14, 4   ;;  %s1396_s10 = smov %s1105_s11 }
 0x234   : > { %s1397_s11 = smov %s1247_s28  ;;  %s1398_s12 = smov %s1113_s13 }
 0x235   : > { %s1399_s13 = smov %s1401_s25  ;;  %18 = sbr.rel (!%p16_p5) target bundleno = 7 (0x7), region = 77 }
 0x23c   :  { %673 = vsyncpa [#allocation3], 1 }
 0x23d   :  { %675 = vsyncpa [#allocation3 + $0x1], 1 }
 0x23e   :  { %676 = vsyncpa [#allocation6], 1 }
 0x23f   :  { %677 = vsyncpa [#allocation4], 1 }
 0x240   :  { %679 = vsyncpa [#allocation4 + $0x1], 1 }

</bundles_post_ra>
